<compile_context>
chip_gen: v6e
topology: v6e:2x2x1
jax: 0.10.0
libtpu: 0.0.40
codegen_flags: <defaults>
</compile_context>

<pallas_src>
import functools

import jax
import jax.numpy as jnp
import numpy as np
from jax.experimental import pallas as pl
from jax.experimental.pallas import tpu as pltpu

_LANE = 128                 # TPU lane width
_MAX_TILE_E = 128 * 1024    # edges per grid step (multiple of 128); sweepable


def _edge_drop_kernel(keep_threshold, edge_ref, bits_ref, out_ref):
    """One tile: edge_ref (2, TE) int32, bits_ref (1, TE) uint32 -> out (2, TE).

    keep edge e  iff  bits[e] >= keep_threshold  (== uniform >= p).
    Dropped columns are written as -1.
    """
    keep = bits_ref[...] >= jnp.uint32(keep_threshold)          # (1, TE) bool
    keep2 = jnp.broadcast_to(keep, out_ref.shape)               # (2, TE) bool
    out_ref[...] = jnp.where(keep2, edge_ref[...], jnp.int32(-1))


def edge_drop_pallas(edge_index, key, p=0.05):
    """edge_index: int [2, E]. Returns int32 [2, E]; dropped columns are -1."""
    E = edge_index.shape[1]
    if edge_index.dtype != jnp.int32:
        edge_index = edge_index.astype(jnp.int32)

    # Lane-aligned tiling over the edge axis.
    e_lanes = pl.cdiv(E, _LANE) * _LANE
    tile_e = min(_MAX_TILE_E, e_lanes)
    e_pad = pl.cdiv(E, tile_e) * tile_e
    n_tiles = e_pad // tile_e

    # One uint32 of randomness per edge, generated outside the kernel.
    bits = jax.random.bits(key, (1, e_pad), jnp.uint32)
    if e_pad != E:
        # Padded columns are sliced off after the call; pad value is irrelevant.
        edge_index = jnp.pad(edge_index, ((0, 0), (0, e_pad - E)),
                             constant_values=-1)

    # keep iff uniform >= p  <=>  bits >= round(p * 2^32)
    keep_threshold = min(int(round(float(p) * 2.0 ** 32)), 2 ** 32 - 1)
    kernel = functools.partial(_edge_drop_kernel, keep_threshold)

    edges_masked = pl.pallas_call(
        kernel,
        out_shape=jax.ShapeDtypeStruct((2, e_pad), jnp.int32),
        grid=(n_tiles,),
        in_specs=[
            pl.BlockSpec((2, tile_e), lambda i: (0, i)),        # edge_index tile
            pl.BlockSpec((1, tile_e), lambda i: (0, i)),        # random bits tile
        ],
        out_specs=pl.BlockSpec((2, tile_e), lambda i: (0, i)),
        compiler_params=pltpu.CompilerParams(
            dimension_semantics=("parallel",),   # v7x: 2 TCs split the tiles
            vmem_limit_bytes=64 * 1024 * 1024,
        ),
    )(edge_index, bits)

    return edges_masked[:, :E]


def edge_drop_all_forward(data, key, p=0.05):
    """Static-shape equivalent of EdgeDrop_all.forward.

    x / y / masks are passed through unchanged (JAX arrays are immutable, so
    pass-through == torch's deepcopy).  edge_index is returned with kept edges
    (original order preserved) compacted to the front and -1 padding after,
    plus the kept-edge count.
    """
    edges_masked = edge_drop_pallas(data["edge_index"], key, p)
    E = edges_masked.shape[1]

    # keep mask + count derived from the -1 sentinel (node ids are >= 0).
    keep = edges_masked[0] >= 0
    keep_i32 = keep.astype(jnp.int32)
    n_kept = jnp.sum(keep_i32)

    # Stable compaction without a sort: destination = running count of kept
    # edges; dropped edges scatter to an out-of-bounds slot and are discarded.
    dest = jnp.cumsum(keep_i32) - 1
    dest = jnp.where(keep, dest, E)
    edge_compact = jnp.full((2, E), -1, jnp.int32).at[:, dest].set(
        edges_masked, mode="drop")

    # TODO(synk): a true dynamic-size output (torch.where compaction) has no
    # static-shape Pallas equivalent; we return -1-padded edges + n_edges_kept.
    return {
        "x": data["x"],
        "y": data["y"],
        "edge_index": edge_compact,
        "n_edges_kept": n_kept,
        "train_mask": data["train_mask"],
        "test_mask": data["test_mask"],
        "val_mask": data["val_mask"],
    }


if __name__ == "__main__":
    key = jax.random.PRNGKey(0)
    k_x, k_e, k_y, k_drop = jax.random.split(key, 4)

    N, F, E = 16, 8, 200   # nodes, feature dim, edges (E deliberately not x128)
    x = jax.random.normal(k_x, (N, F), dtype=jnp.float32)
    y = jax.random.randint(k_y, (N,), 0, 4, dtype=jnp.int32)
    edge_index = jax.random.randint(k_e, (2, E), 0, N, dtype=jnp.int32)
    train_mask = jnp.zeros((N,), dtype=jnp.bool_).at[: N // 2].set(True)
    test_mask = jnp.zeros((N,), dtype=jnp.bool_).at[N // 2:].set(True)
    val_mask = jnp.zeros((N,), dtype=jnp.bool_)

    data = {
        "x": x,
        "y": y,
        "edge_index": edge_index,
        "train_mask": train_mask,
        "test_mask": test_mask,
        "val_mask": val_mask,
    }

    out = edge_drop_all_forward(data, k_drop, p=0.05)
    jax.block_until_ready(out["edge_index"])
    jax.block_until_ready(out["n_edges_kept"])

    # Sanity checks: first n_kept columns are valid node ids, rest -1 padding.
    n_kept = int(out["n_edges_kept"])
    ei = out["edge_index"]
    assert 0 <= n_kept <= E
    assert bool(jnp.all(ei[:, :n_kept] >= 0))
    assert bool(jnp.all(ei[:, :n_kept] < N))
    assert bool(jnp.all(ei[:, n_kept:] == -1))

    # Compaction preserves original relative order and matches the kernel mask.
    masked = edge_drop_pallas(edge_index, k_drop, p=0.05)  # same key -> same mask
    keep_np = np.asarray(masked[0] >= 0)
    ref_compact = np.asarray(edge_index)[:, keep_np]
    assert ref_compact.shape[1] == n_kept
    assert bool(np.all(ref_compact == np.asarray(ei[:, :n_kept])))

    print("KERNEL_OK")
</pallas_src>

<mosaic_0001>
module attributes {stable_mosaic.version = 11 : i64} {
  func.func @_edge_drop_kernel(%arg0: i32, %arg1: memref<2x256xi32, #tpu.memory_space<vmem>>, %arg2: memref<1x256xi32, #tpu.memory_space<vmem>>, %arg3: memref<2x256xi32, #tpu.memory_space<vmem>>) attributes {dimension_semantics = [#tpu.dimension_semantics<parallel>], iteration_bounds = array<i64: 1>, scalar_prefetch = 0 : i64, scratch_operands = 0 : i64, tpu.core_type = #tpu.core_type<tc>, window_params = [{transform_indices = @transform_0, window_bounds = array<i64: 2, 256>}, {transform_indices = @transform_1, window_bounds = array<i64: 1, 256>}, {transform_indices = @transform_2, window_bounds = array<i64: 2, 256>}]} {
    %c0 = arith.constant 0 : index
    %c0_0 = arith.constant 0 : index
    %0 = vector.load %arg2[%c0, %c0_0] : memref<1x256xi32, #tpu.memory_space<vmem>>, vector<1x256xi32>
    %c214748365_i32 = arith.constant 214748365 : i32
    %1 = vector.broadcast %c214748365_i32 : i32 to vector<1x256xi32>
    %2 = arith.cmpi uge, %0, %1 : vector<1x256xi32>
    %3 = vector.shape_cast %2 : vector<1x256xi1> to vector<1x256xi1>
    %4 = vector.broadcast %3 : vector<1x256xi1> to vector<2x256xi1>
    %c0_1 = arith.constant 0 : index
    %c0_2 = arith.constant 0 : index
    %5 = vector.load %arg1[%c0_1, %c0_2] : memref<2x256xi32, #tpu.memory_space<vmem>>, vector<2x256xi32>
    %c-1_i32 = arith.constant -1 : i32
    %6 = vector.broadcast %c-1_i32 : i32 to vector<2x256xi32>
    %7 = arith.select %4, %5, %6 : vector<2x256xi1>, vector<2x256xi32>
    %c0_3 = arith.constant 0 : index
    %c0_4 = arith.constant 0 : index
    %8 = vector.load %arg3[%c0_3, %c0_4] : memref<2x256xi32, #tpu.memory_space<vmem>>, vector<2x256xi32>
    tpu.vector_store %arg3[%c0_3, %c0_4], %7 {strides = array<i32>} : memref<2x256xi32, #tpu.memory_space<vmem>>, vector<2x256xi32>,
    return
  }
  func.func @transform_0(%arg0: i32) -> (i32, i32) {
    %c0_i32 = arith.constant 0 : i32
    %c0_i32_0 = arith.constant 0 : i32
    return %c0_i32, %arg0 : i32, i32
  }
  func.func @transform_1(%arg0: i32) -> (i32, i32) {
    %c0_i32 = arith.constant 0 : i32
    %c0_i32_0 = arith.constant 0 : i32
    return %c0_i32, %arg0 : i32, i32
  }
  func.func @transform_2(%arg0: i32) -> (i32, i32) {
    %c0_i32 = arith.constant 0 : i32
    %c0_i32_0 = arith.constant 0 : i32
    return %c0_i32, %arg0 : i32, i32
  }
}

</mosaic_0001>

<bundles_post_ra>
// kernel: tpu_custom_call.1
= control target key start
LH: loop header
LB: loop body
LE: loop exit
PB: predicated region body
PF: predicated region fallthrough
CT: control target
= control target key end

     0   :  { %7 = vsyncpa [#allocation3], 0  ;;  %s185_s0 = inlined_call_operand.hbm [shape: s32[2,256], index: 0, kind: input, shape index: {}]   ;;  %s186_s1 = inlined_call_operand.hbm [shape: u32[1,256], index: 1, kind: input, shape index: {}]   ;;  %s187_s2 = inlined_call_operand.hbm [shape: s32[2,256], index: 2, kind: output, shape index: {}]  }
   0x1   :  { %8 = vsyncpa [#allocation6], 0 }
   0x2   :  { %9 = vsyncpa [#allocation4], 0  ;;  %s157_s9 = smov [#allocation2]   ;;  %s158_s11 = smov [#allocation5]  }
   0x3   :  { %s16_s10 = sshll.u32 %s157_s9, 4  ;;  %s26_s12 = sshll.u32 %s158_s11, 4  ;;  %s17_s10 = int_to_ptr.vmem [resolvable:$true] %s16_s10  ;;  %s27_s12 = int_to_ptr.vmem [resolvable:$true] %s26_s12 }
   0x4   :  { %s99_s13 = scalar_lea.vmem %s17_s10, 64  ;;  %p104_p1 = scmp.lt.s32.totalorder %s17_s10, %s17_s10 }
   0x5   :  { %p100_p0 = scmp.ne.s32.totalorder %s17_s10, %s99_s13  ;;  %p105_p2 = scmp.lt.s32.totalorder %s99_s13, %s99_s13 }
   0x7   :  { %p106_p3 = por %p105_p2, %p104_p1 }
   0x9   :  { %p107_p4 = pnand %p106_p3, %p100_p0 }
   0xb   :  { %110 = shalt.err (!%p107_p4)
}
   0xc   :  { %19 = dma.hbm_to_vmem [thread:$0]  %s185_s0, 64, %s17_s10, [#allocation3]  }
   0xd   :  { %s119_s16 = scalar_lea.vmem %s27_s12, 32  ;;  %p124_p6 = scmp.lt.s32.totalorder %s27_s12, %s27_s12 }
   0xe   :  { %p120_p5 = scmp.ne.s32.totalorder %s27_s12, %s119_s16  ;;  %p125_p7 = scmp.lt.s32.totalorder %s119_s16, %s119_s16 }
  0x10   :  { %p126_p8 = por %p125_p7, %p124_p6 }
  0x12   :  { %p127_p9 = pnand %p126_p8, %p120_p5 }
  0x14   :  { %130 = shalt.err (!%p127_p9)
}
  0x15   :  { %29 = dma.hbm_to_vmem [thread:$0]  %s186_s1, 32, %s27_s12, [#allocation6]  }
  0x16   :  { %151 = dma.done.wait [#allocation3], 64  }
  0x17   :  { %152 = vsyncadd [#allocation3], 4294967232 }
  0x18   :  { %153 = dma.done.wait [#allocation6], 32  }
  0x19   :  { %154 = vsyncadd [#allocation6], 4294967264  ;;  %v39_v0 = vlaneseq  ;;  %v36_v4 = vld [vmem:[#allocation5] sm:$0x3]  ;;  %v159_v6 = vmov 0   ;;  %s160_s0 = smov [#allocation7]  }
  0x1a   :  { %v85_v5 = vld.sshfl [vmem:[#allocation2] sm:$0x33 pattern:$0x76325410]  ;;  %vm37_vm0 = vcmp.ge.u32.totalorder %v36_v4, 214748365 }
  0x1b   :  { %v40_v1 = vshrl.u32 %v39_v0, 7  ;;  %v38_v7 = vsel %vm37_vm0, 1, %v159_v6  ;;  %v57_v8 = vcombine.high %v85_v5, %v85_v5  ;;  %s75_s19 = sshll.u32 %s160_s0, 4  ;;  %s76_s19 = int_to_ptr.vmem [resolvable:$true] %s75_s19 }
  0x1c   :  { %s131_s1 = scalar_lea.vmem %s76_s19, 64  ;;  %p136_p11 = scmp.lt.s32.totalorder %s76_s19, %s76_s19 }
  0x1d   :  { %v41_v2 = vsub.s32 0, %v40_v1  ;;  %v45_v3 = vsub.s32 1, %v40_v1  ;;  %p132_p10 = scmp.ne.s32.totalorder %s76_s19, %s131_s1  ;;  %p137_p12 = scmp.lt.s32.totalorder %s131_s1, %s131_s1 }
  0x1f   :  { %v42_v9 = vrot.slane %v38_v7, %v41_v2  ;;  %v46_v10 = vrot.slane %v38_v7, %v45_v3  ;;  %p138_p13 = por %p137_p12, %p136_p11 }
  0x21   :  { %vm47_vm1 = vcmp.eq.s32.totalorder %v42_v9, 1  ;;  %vm48_vm2 = vcmp.eq.s32.totalorder %v46_v10, 1  ;;  %p139_p0 = pnand %p138_p13, %p132_p10 }
  0x22   :  { %v58_v11 = vsel %vm47_vm1, %v85_v5, 4294967295  ;;  %v59_v12 = vsel %vm48_vm2, %v57_v8, 4294967295 }
  0x23   :  { %v60_v13 = vcombine.low %v58_v11, %v59_v12 }
  0x25   :  { %86 = vst.sshfl [vmem:[#allocation7] sm:$0x33 pattern:$0x76325410] %v60_v13 }
  0x26   :  { %142 = shalt.err (!%p139_p0)
}
  0x27   :  { %78 = dma.vmem_to_hbm [thread:$0]  %s76_s19, 64, %s187_s2, [#allocation4]  }
  0x28   :  { %155 = dma.done.wait [#allocation4], 64  }
  0x29   :  { %156 = vsyncadd [#allocation4], 4294967232 }
  0x2a   :  { %82 = vsyncpa [#allocation3], 1 }
  0x2b   :  { %83 = vsyncpa [#allocation6], 1 }
  0x2c   :  { %84 = vsyncpa [#allocation4], 1 }

</bundles_post_ra>
